<compile_context>
chip_gen: v6e
topology: v6e:2x2x1
jax: 0.10.0
libtpu: 0.0.40
codegen_flags: <defaults>
</compile_context>

<pallas_src>
import math

import jax
import jax.numpy as jnp
from jax import lax
from jax.experimental import pallas as pl
from jax.experimental.pallas import tpu as pltpu


# ----------------------------------------------------------------------------
# Single fused kernel: rgb projection + language projection + grounding.
# ----------------------------------------------------------------------------
def _fused_vaq_kernel(img_ref, txt_ref,
                      w_rgb_t_ref, w_lang_ref, b_lang_ref, b_rgb_ref,
                      w_box_ref, b_box_ref,
                      o_ref):
    B = img_ref.shape[0]
    # In-kernel f32 -> bf16 casts (free VPU filler; avoids a separate XLA
    # cast pass and the extra HBM traffic it implies).
    img = img_ref[...].astype(jnp.bfloat16)            # (B, C, HW)
    txt = txt_ref[...].astype(jnp.bfloat16)            # (B*S, T)

    # --- language module: one (B*S, T) @ (T, D) matmul, f32 accumulation.
    lang = lax.dot_general(
        txt, w_lang_ref[...],
        dimension_numbers=(((1,), (0,)), ((), ())),
        preferred_element_type=jnp.float32) + b_lang_ref[...]          # (B*S, D)

    D = lang.shape[-1]
    S = lang.shape[0] // B
    # 1/sqrt(D) folded into the bf16 query copy used only for the scores
    # matmul: scales B*S x D elements instead of B*S x HW scores (8x less).
    lang_q = (lang * (1.0 / math.sqrt(D))).astype(jnp.bfloat16)

    # --- rgb + grounding modules, statically unrolled over the small batch.
    att_rows = []
    for b in range(B):
        # 1x1 conv == (D, C) @ (C, HW).  rgb bias hoisted (added exactly to
        # `fused` below): softmax is invariant to the per-row lang·b_rgb
        # constant, and attn rows sum to 1.
        vis_t = lax.dot_general(
            w_rgb_t_ref[...], img[b],
            dimension_numbers=(((1,), (0,)), ((), ())),
            preferred_element_type=jnp.float32)                        # (D, HW)
        vis_bf = vis_t.astype(jnp.bfloat16)

        q_b = lax.slice(lang_q, (b * S, 0), ((b + 1) * S, D))          # (S, D)
        scores = lax.dot_general(
            q_b, vis_bf,
            dimension_numbers=(((1,), (0,)), ((), ())),
            preferred_element_type=jnp.float32)                        # (S, HW)

        # softmax over spatial positions — all elementwise math in f32.
        m = scores.max(axis=-1, keepdims=True)
        p = jnp.exp(scores - m)
        denom = p.sum(axis=-1, keepdims=True)
        attn = p * pl.reciprocal(denom, approx=True)                   # (S, HW)

        # attn (S, HW) contracted with vis_bf (D, HW) over HW -> (S, D)
        att_rows.append(lax.dot_general(
            attn.astype(jnp.bfloat16), vis_bf,
            dimension_numbers=(((1,), (1,)), ((), ())),
            preferred_element_type=jnp.float32))

    att_vis = jnp.concatenate(att_rows, axis=0)                        # (B*S, D)

    # Hoisted rgb bias re-enters here, exact in f32 (kept out of bf16 path).
    fused = att_vis + lang + b_rgb_ref[...]                            # (B*S, D)

    # --- box-regression head: single (B*S, D) @ (D, 4) matmul + sigmoid.
    box = lax.dot_general(
        fused.astype(jnp.bfloat16), w_box_ref[...],
        dimension_numbers=(((1,), (0,)), ((), ())),
        preferred_element_type=jnp.float32) + b_box_ref[...]           # (B*S, 4)
    o_ref[...] = jax.nn.sigmoid(box).astype(o_ref.dtype)


def fused_vaq_forward(img, txt_flat, w_rgb_t, w_lang, b_lang, b_rgb,
                      w_box, b_box):
    """img: (B, C, HW) f32, txt_flat: (B*S, T) f32 -> boxes (B*S, 4) f32."""
    bs = txt_flat.shape[0]
    return pl.pallas_call(
        _fused_vaq_kernel,
        out_shape=jax.ShapeDtypeStruct((bs, 4), jnp.float32),
        # No grid: single invocation, full arrays resident in VMEM.
        compiler_params=pltpu.CompilerParams(
            vmem_limit_bytes=32 * 1024 * 1024),
    )(img, txt_flat, w_rgb_t, w_lang, b_lang, b_rgb, w_box, b_box)


# ----------------------------------------------------------------------------
# Executor wrapper (parameter setup / free reshapes only — no wrapper casts)
# ----------------------------------------------------------------------------
class BasicVaQExecutorPallas:
    def __init__(self, key, *, in_channels, text_dim, hidden):
        k1, k2, k3, k4, k5, k6 = jax.random.split(key, 6)
        # language module: Linear(text_dim, hidden); matmul weights in bf16.
        self.w_lang = (jax.random.normal(k1, (text_dim, hidden), jnp.float32)
                       * 0.02).astype(jnp.bfloat16)
        self.b_lang = (jax.random.normal(k2, (hidden,), jnp.float32)
                       * 0.02).reshape(1, hidden)                       # f32
        # rgb module: 1x1 Conv2d(in_channels, hidden); stored pre-transposed
        # as (hidden, in_channels) so the kernel does a standard matmul.
        self.w_rgb_t = (jax.random.normal(k3, (in_channels, hidden), jnp.float32)
                        * 0.02).T.astype(jnp.bfloat16)
        self.b_rgb = (jax.random.normal(k4, (hidden,), jnp.float32)
                      * 0.02).reshape(1, hidden)                        # f32 (hoisted)
        # grounding head: Linear(hidden, 4)
        self.w_box = (jax.random.normal(k5, (hidden, 4), jnp.float32)
                      * 0.02).astype(jnp.bfloat16)
        self.b_box = (jax.random.normal(k6, (4,), jnp.float32)
                      * 0.02).reshape(1, 4)                             # f32
        # TODO(synk): resume_module (pretrained checkpoint loading) has no
        # Pallas equivalent; parameters are synthesized deterministically.

    def __call__(self, image_nchw, text_embed):
        B, C, H, W = image_nchw.shape
        _, S, T = text_embed.shape
        # Free, contiguous reshapes (no HBM transpose / cast passes).
        img = image_nchw.reshape(B, C, H * W)        # f32; cast to bf16 in-kernel
        txt = text_embed.reshape(B * S, T)           # f32; cast to bf16 in-kernel
        boxes_flat = fused_vaq_forward(img, txt,
                                       self.w_rgb_t, self.w_lang,
                                       self.b_lang, self.b_rgb,
                                       self.w_box, self.b_box)
        return boxes_flat.reshape(B, S, 4)


if __name__ == "__main__":
    key = jax.random.PRNGKey(0)
    k_img, k_txt, k_par = jax.random.split(key, 3)

    B, C, H, W = 2, 4, 16, 16      # image: NCHW
    S, T, D = 8, 16, 32            # seq len, text embed dim, hidden dim

    image = jax.random.normal(k_img, (B, C, H, W), jnp.float32)
    text = jax.random.normal(k_txt, (B, S, T), jnp.float32)

    executor = BasicVaQExecutorPallas(k_par, in_channels=C, text_dim=T, hidden=D)
    boxes = executor(image, text)
    jax.block_until_ready(boxes)

    assert boxes.shape == (B, S, 4) and boxes.dtype == jnp.float32
    assert bool(jnp.all(jnp.isfinite(boxes)))
    assert bool(jnp.all((boxes >= 0.0) & (boxes <= 1.0)))   # sigmoid range
    print("KERNEL_OK")
</pallas_src>

<mosaic_0001>
module attributes {stable_mosaic.version = 11 : i64} {
  func.func @_fused_vaq_kernel(%arg0: memref<2x4x256xf32, #tpu.memory_space<vmem>>, %arg1: memref<16x16xf32, #tpu.memory_space<vmem>>, %arg2: memref<32x4xbf16, #tpu.memory_space<vmem>>, %arg3: memref<16x32xbf16, #tpu.memory_space<vmem>>, %arg4: memref<1x32xf32, #tpu.memory_space<vmem>>, %arg5: memref<1x32xf32, #tpu.memory_space<vmem>>, %arg6: memref<32x4xbf16, #tpu.memory_space<vmem>>, %arg7: memref<1x4xf32, #tpu.memory_space<vmem>>, %arg8: memref<16x4xf32, #tpu.memory_space<vmem>>) attributes {dimension_semantics = [], scalar_prefetch = 0 : i64, scratch_operands = 0 : i64, tpu.core_type = #tpu.core_type<tc>} {
    %c0 = arith.constant 0 : index
    %c0_0 = arith.constant 0 : index
    %c0_1 = arith.constant 0 : index
    %0 = vector.load %arg0[%c0, %c0_0, %c0_1] : memref<2x4x256xf32, #tpu.memory_space<vmem>>, vector<2x4x256xf32>
    %1 = arith.truncf %0 : vector<2x4x256xf32> to vector<2x4x256xbf16>
    %c0_2 = arith.constant 0 : index
    %c0_3 = arith.constant 0 : index
    %2 = vector.load %arg1[%c0_2, %c0_3] : memref<16x16xf32, #tpu.memory_space<vmem>>, vector<16x16xf32>
    %3 = arith.truncf %2 : vector<16x16xf32> to vector<16x16xbf16>
    %c0_4 = arith.constant 0 : index
    %c0_5 = arith.constant 0 : index
    %4 = vector.load %arg3[%c0_4, %c0_5] : memref<16x32xbf16, #tpu.memory_space<vmem>>, vector<16x32xbf16>
    %cst = arith.constant dense<0.000000e+00> : vector<16x32xf32>
    %5 = tpu.matmul %3, %4, %cst {dimension_numbers = #tpu.dot_dimension_numbers<[1], [0], [0], [1], [0, 0, 1, 1], [], []>} : vector<16x16xbf16>, vector<16x32xbf16>, vector<16x32xf32> -> vector<16x32xf32>
    %c0_6 = arith.constant 0 : index
    %c0_7 = arith.constant 0 : index
    %6 = vector.load %arg4[%c0_6, %c0_7] : memref<1x32xf32, #tpu.memory_space<vmem>>, vector<1x32xf32>
    %7 = vector.broadcast %6 : vector<1x32xf32> to vector<16x32xf32>
    %8 = arith.addf %5, %7 : vector<16x32xf32>
    %cst_8 = arith.constant 0.176776692 : f32
    %9 = vector.broadcast %cst_8 : f32 to vector<16x32xf32>
    %10 = arith.mulf %8, %9 : vector<16x32xf32>
    %11 = arith.truncf %10 : vector<16x32xf32> to vector<16x32xbf16>
    %c0_9 = arith.constant 0 : index
    %c0_10 = arith.constant 0 : index
    %12 = vector.load %arg2[%c0_9, %c0_10] : memref<32x4xbf16, #tpu.memory_space<vmem>>, vector<32x4xbf16>
    %13 = vector.extract_strided_slice %1 {offsets = [0, 0, 0], sizes = [1, 4, 256], strides = [1, 1, 1]} : vector<2x4x256xbf16> to vector<1x4x256xbf16>
    %14 = vector.shape_cast %13 : vector<1x4x256xbf16> to vector<4x256xbf16>
    %cst_11 = arith.constant dense<0.000000e+00> : vector<32x256xf32>
    %15 = tpu.matmul %12, %14, %cst_11 {dimension_numbers = #tpu.dot_dimension_numbers<[1], [0], [0], [1], [0, 0, 1, 1], [], []>} : vector<32x4xbf16>, vector<4x256xbf16>, vector<32x256xf32> -> vector<32x256xf32>
    %16 = arith.truncf %15 : vector<32x256xf32> to vector<32x256xbf16>
    %17 = vector.extract_strided_slice %11 {offsets = [0, 0], sizes = [8, 32], strides = [1, 1]} : vector<16x32xbf16> to vector<8x32xbf16>
    %cst_12 = arith.constant dense<0.000000e+00> : vector<8x256xf32>
    %18 = tpu.matmul %17, %16, %cst_12 {dimension_numbers = #tpu.dot_dimension_numbers<[1], [0], [0], [1], [0, 0, 1, 1], [], []>} : vector<8x32xbf16>, vector<32x256xbf16>, vector<8x256xf32> -> vector<8x256xf32>
    %cst_13 = arith.constant dense<0xFF800000> : vector<8xf32>
    %19 = vector.multi_reduction <maximumf>, %18, %cst_13 [1] : vector<8x256xf32> to vector<8xf32>
    %20 = vector.shape_cast %19 : vector<8xf32> to vector<8x1xf32>
    %21 = vector.broadcast %20 : vector<8x1xf32> to vector<8x256xf32>
    %22 = arith.subf %18, %21 : vector<8x256xf32>
    %23 = math.exp %22 : vector<8x256xf32>
    %cst_14 = arith.constant dense<0.000000e+00> : vector<8xf32>
    %24 = vector.multi_reduction <add>, %23, %cst_14 [1] : vector<8x256xf32> to vector<8xf32>
    %25 = vector.shape_cast %24 : vector<8xf32> to vector<8x1xf32>
    %26 = tpu.reciprocal %25 {approx = true} : vector<8x1xf32> -> vector<8x1xf32>
    %27 = vector.broadcast %26 : vector<8x1xf32> to vector<8x256xf32>
    %28 = arith.mulf %23, %27 : vector<8x256xf32>
    %29 = arith.truncf %28 : vector<8x256xf32> to vector<8x256xbf16>
    %cst_15 = arith.constant dense<0.000000e+00> : vector<8x32xf32>
    %30 = tpu.matmul %29, %16, %cst_15 {dimension_numbers = #tpu.dot_dimension_numbers<[1], [1], [0], [0], [0, 0, 1, 0], [], []>} : vector<8x256xbf16>, vector<32x256xbf16>, vector<8x32xf32> -> vector<8x32xf32>
    %c0_16 = arith.constant 0 : index
    %c0_17 = arith.constant 0 : index
    %31 = vector.load %arg2[%c0_16, %c0_17] : memref<32x4xbf16, #tpu.memory_space<vmem>>, vector<32x4xbf16>
    %32 = vector.extract_strided_slice %1 {offsets = [1, 0, 0], sizes = [1, 4, 256], strides = [1, 1, 1]} : vector<2x4x256xbf16> to vector<1x4x256xbf16>
    %33 = vector.shape_cast %32 : vector<1x4x256xbf16> to vector<4x256xbf16>
    %cst_18 = arith.constant dense<0.000000e+00> : vector<32x256xf32>
    %34 = tpu.matmul %31, %33, %cst_18 {dimension_numbers = #tpu.dot_dimension_numbers<[1], [0], [0], [1], [0, 0, 1, 1], [], []>} : vector<32x4xbf16>, vector<4x256xbf16>, vector<32x256xf32> -> vector<32x256xf32>
    %35 = arith.truncf %34 : vector<32x256xf32> to vector<32x256xbf16>
    %36 = vector.extract_strided_slice %11 {offsets = [8, 0], sizes = [8, 32], strides = [1, 1]} : vector<16x32xbf16> to vector<8x32xbf16>
    %cst_19 = arith.constant dense<0.000000e+00> : vector<8x256xf32>
    %37 = tpu.matmul %36, %35, %cst_19 {dimension_numbers = #tpu.dot_dimension_numbers<[1], [0], [0], [1], [0, 0, 1, 1], [], []>} : vector<8x32xbf16>, vector<32x256xbf16>, vector<8x256xf32> -> vector<8x256xf32>
    %cst_20 = arith.constant dense<0xFF800000> : vector<8xf32>
    %38 = vector.multi_reduction <maximumf>, %37, %cst_20 [1] : vector<8x256xf32> to vector<8xf32>
    %39 = vector.shape_cast %38 : vector<8xf32> to vector<8x1xf32>
    %40 = vector.broadcast %39 : vector<8x1xf32> to vector<8x256xf32>
    %41 = arith.subf %37, %40 : vector<8x256xf32>
    %42 = math.exp %41 : vector<8x256xf32>
    %cst_21 = arith.constant dense<0.000000e+00> : vector<8xf32>
    %43 = vector.multi_reduction <add>, %42, %cst_21 [1] : vector<8x256xf32> to vector<8xf32>
    %44 = vector.shape_cast %43 : vector<8xf32> to vector<8x1xf32>
    %45 = tpu.reciprocal %44 {approx = true} : vector<8x1xf32> -> vector<8x1xf32>
    %46 = vector.broadcast %45 : vector<8x1xf32> to vector<8x256xf32>
    %47 = arith.mulf %42, %46 : vector<8x256xf32>
    %48 = arith.truncf %47 : vector<8x256xf32> to vector<8x256xbf16>
    %cst_22 = arith.constant dense<0.000000e+00> : vector<8x32xf32>
    %49 = tpu.matmul %48, %35, %cst_22 {dimension_numbers = #tpu.dot_dimension_numbers<[1], [1], [0], [0], [0, 0, 1, 0], [], []>} : vector<8x256xbf16>, vector<32x256xbf16>, vector<8x32xf32> -> vector<8x32xf32>
    %50 = tpu.concatenate %30, %49 in 0 : vector<8x32xf32>, vector<8x32xf32> -> vector<16x32xf32>
    %51 = arith.addf %50, %8 : vector<16x32xf32>
    %c0_23 = arith.constant 0 : index
    %c0_24 = arith.constant 0 : index
    %52 = vector.load %arg5[%c0_23, %c0_24] : memref<1x32xf32, #tpu.memory_space<vmem>>, vector<1x32xf32>
    %53 = vector.broadcast %52 : vector<1x32xf32> to vector<16x32xf32>
    %54 = arith.addf %51, %53 : vector<16x32xf32>
    %55 = arith.truncf %54 : vector<16x32xf32> to vector<16x32xbf16>
    %c0_25 = arith.constant 0 : index
    %c0_26 = arith.constant 0 : index
    %56 = vector.load %arg6[%c0_25, %c0_26] : memref<32x4xbf16, #tpu.memory_space<vmem>>, vector<32x4xbf16>
    %cst_27 = arith.constant dense<0.000000e+00> : vector<16x4xf32>
    %57 = tpu.matmul %55, %56, %cst_27 {dimension_numbers = #tpu.dot_dimension_numbers<[1], [0], [0], [1], [0, 0, 1, 1], [], []>} : vector<16x32xbf16>, vector<32x4xbf16>, vector<16x4xf32> -> vector<16x4xf32>
    %c0_28 = arith.constant 0 : index
    %c0_29 = arith.constant 0 : index
    %58 = vector.load %arg7[%c0_28, %c0_29] : memref<1x4xf32, #tpu.memory_space<vmem>>, vector<1x4xf32>
    %59 = vector.broadcast %58 : vector<1x4xf32> to vector<16x4xf32>
    %60 = arith.addf %57, %59 : vector<16x4xf32>
    %61 = arith.negf %60 : vector<16x4xf32>
    %62 = math.exp %61 : vector<16x4xf32>
    %cst_30 = arith.constant 1.000000e+00 : f32
    %63 = vector.broadcast %cst_30 : f32 to vector<16x4xf32>
    %64 = arith.addf %63, %62 : vector<16x4xf32>
    %65 = arith.divf %63, %64 : vector<16x4xf32>
    %c0_31 = arith.constant 0 : index
    %c0_32 = arith.constant 0 : index
    %66 = vector.load %arg8[%c0_31, %c0_32] : memref<16x4xf32, #tpu.memory_space<vmem>>, vector<16x4xf32>
    tpu.vector_store %arg8[%c0_31, %c0_32], %65 {strides = array<i32>} : memref<16x4xf32, #tpu.memory_space<vmem>>, vector<16x4xf32>,
    return
  }
}

</mosaic_0001>

<bundles_post_ra>
// kernel: tpu_custom_call.1
= control target key start
LH: loop header
LB: loop body
LE: loop exit
PB: predicated region body
PF: predicated region fallthrough
CT: control target
= control target key end

     0   :  { %vm129_vm0 = vcmask 1041408   ;;  %v627_v1 = vmov 0   ;;  %v628_v2 = vmov 0.0   ;;  %vm629_vm1 = vmmov 0   ;;  %s751_s0 = inlined_call_operand.vmem [shape: f32[2,4,256], index: 0, kind: input, shape index: {}]   ;;  %s752_s2 = inlined_call_operand.vmem [shape: bf16[32,4], index: 2, kind: input, shape index: {}]   ;;  %s753_s3 = inlined_call_operand.vmem [shape: bf16[16,32], index: 3, kind: input, shape index: {}]   ;;  %s754_s1 = inlined_call_operand.vmem [shape: f32[16,16], index: 1, kind: input, shape index: {}]   ;;  %s755_s4 = inlined_call_operand.vmem [shape: f32[1,32], index: 4, kind: input, shape index: {}]   ;;  %s756_s6 = inlined_call_operand.vmem [shape: bf16[32,4], index: 6, kind: input, shape index: {}]   ;;  %s757_s5 = inlined_call_operand.vmem [shape: f32[1,32], index: 5, kind: input, shape index: {}]   ;;  %s758_s7 = inlined_call_operand.vmem [shape: f32[1,4], index: 7, kind: input, shape index: {}]   ;;  %s759_s8 = inlined_call_operand.vmem [shape: f32[16,4], index: 8, kind: output, shape index: {}]  }
   0x1   :  { %v30_v0 = vld [vmem:[%s751_s0] sm:$0xff]  ;;  %168 = vmatprep.mubr.bf16.mxu1 %v627_v1  ;;  %583 = vmatprep.subr.bf16.mxu0 %v628_v2  ;;  %v43_v9 = vld [vmem:[%s754_s1 + $0x8] sm:$0xff]  ;;  %vm60_vm2 = vcmask 130048   ;;  %vm122_vm3 = vcmask 31744   ;;  %vm193_vm4 = vcmask 261120  }
   0x2   :  { %v34_v3 = vcombine.high %v30_v0, %v30_v0  ;;  %v38_v4 = vpack.c.bf16 %v30_v0, %v30_v0  ;;  %585 = vmatprep.mubr.msk.bf16.mxu0 %vm629_vm1, %v628_v2  ;;  %v603_v5 = vld [vmem:[%s753_s3] sm:$0xff]   ;;  %v604_v12 = vld [vmem:[%s752_s2 + $0x8] sm:$0xff]  }
   0x3   :  { %v42_v8 = vld [vmem:[%s754_s1] sm:$0xff]  ;;  %584 = vmatpush3.bf16.msra.mxu0 %v603_v5  ;;  %v31_v23 = vld [vmem:[%s751_s0 + $0x8] sm:$0xff] }
   0x4   :  { %v39_v6 = vpack.c.bf16 %v34_v3, %v34_v3  ;;  %v131_v7 = vsel %vm129_vm0, %v38_v4, 0  ;;  %v602_v10 = vld [vmem:[%s752_s2] sm:$0xff]   ;;  %v44_v11 = vpack.c.bf16 %v43_v9, %v42_v8  ;;  %v35_v27 = vcombine.high %v31_v23, %v31_v23 }
   0x5   :  { %v558_v24 = vld [vmem:[%s755_s4] ss:$0 sm:$0xff]  ;;  %v40_v38 = vpack.c.bf16 %v31_v23, %v31_v23 }
   0x6   :  { %563 = vmatprep.subr.msk.bf16.mxu1 %vm129_vm0, %v39_v6  ;;  %586 = vmatmul.mubr.msk.bf16.vlgmr.msra.gmra.mxu0 %vm60_vm2, %v44_v11  ;;  %v41_v33 = vpack.c.bf16 %v35_v27, %v35_v27 }
   0x7   :  { %151 = vmatpush1.bf16.msra.mxu1 %v131_v7  ;;  %229 = vmatprep.mubr.bf16.mxu0 %v627_v1  ;;  %v296_v39 = vsel %vm129_vm0, %v40_v38, 0 }
   0xa   :  { %564 = vmatmul.mubr.msk.bf16.vlgmr.msra.gmra.mxu1 %vm122_vm3, %v602_v10 }
   0xb   :  { %178 = vmatprep.mubr.bf16.mxu1 %v627_v1 }
  0x12   :  { %565 = vmatmul.mubr.msk.bf16.gmra.mxu1 %vm122_vm3, %v604_v12 }
  0xc6   :  { %v98_v13 = vpop.f32.mrf.mxu0 }
  0xc7   :  { %v709_v28 = vadd.f32 %v558_v24, %v98_v13 }
  0xc8   :  { %v587_v15 = vpop.f32.mrf.mxu0 }
  0xc9   :  { %v105_v34 = vmul.f32 0.17677669, %v709_v28 }
  0xca   :  { %v170_v14 = vpop.f32.mrf.mxu1  ;;  %v101_v17 = vpop.f32.mrf.mxu0 }
  0xcb   :  { %v711_v29 = vadd.f32 %v558_v24, %v101_v17 }
  0xcc   :  { %v172_v16 = vpop.f32.mrf.mxu1  ;;  %v588_v19 = vpop.f32.mrf.mxu0 }
  0xcd   :  { %v106_v35 = vmul.f32 0.17677669, %v711_v29 }
  0xce   :  { %v174_v18 = vpop.f32.mrf.mxu1 }
  0xcf   :  { %v189_v36 = vpack.c.bf16 %v174_v18, %v170_v14  ;;  %v107_v37 = vpack.c.bf16 %v106_v35, %v105_v34  ;;  %v605_v34 = vld [vmem:[%s756_s6 + $0x8] sm:$0xff]   ;;  %v606_v35 = vld [vmem:[%s756_s6] sm:$0xff]  }
  0xd0   :  { %v176_v20 = vpop.f32.mrf.mxu1 }
  0xd1   :  { %v190_v32 = vpack.c.bf16 %v176_v20, %v172_v16  ;;  %v359_v9 = vrot.slane %v107_v37, 4 }
  0xd2   :  { %v180_v21 = vpop.f32.mrf.mxu1 }
  0xd4   :  { %v182_v22 = vpop.f32.mrf.mxu1 }
  0xd6   :  { %v184_v25 = vpop.f32.mrf.mxu1 }
  0xd7   :  { %v191_v31 = vpack.c.bf16 %v184_v25, %v180_v21 }
  0xd8   :  { %v186_v26 = vpop.f32.mrf.mxu1 }
  0xd9   :  { %v192_v30 = vpack.c.bf16 %v186_v26, %v182_v22 }
  0xdb   :  { %209 = vmatprep.subr.bf16.mxu0 %v192_v30  ;;  %267 = vmatprep.subr.bf16.mxu1 %v192_v30 }
  0xdc   :  { %210 = vmatpush1.bf16.msra.mxu0 %v191_v31  ;;  %268 = vmatpush1.bf16.xpose.msra.mxu1 %v191_v31 }
  0xdd   :  { %211 = vmatprep.subr.bf16.mxu0 %v190_v32  ;;  %269 = vmatprep.subr.bf16.mxu1 %v190_v32 }
  0xe0   :  { %212 = vmatpush1.bf16.msra.mxu0 %v189_v36 }
  0xe1   :  { %567 = vmatprep.subr.msk.bf16.mxu0 %vm129_vm0, %v41_v33 }
  0xe3   :  { %566 = vmatmul.mubr.msk.bf16.vlgmr.msra.gmra.mxu0 %vm193_vm4, %v107_v37  ;;  %v571_v37 = vld [vmem:[%s757_s5] ss:$0 sm:$0xff] }
  0xe4   :  { %270 = vmatpush1.bf16.xpose.msra.mxu1 %v189_v36  ;;  %333 = vmatprep.mubr.bf16.mxu0 %v627_v1 }
  0xe5   :  { %316 = vmatpush1.bf16.msra.mxu0 %v296_v39 }
  0xeb   :  { %568 = vmatmul.mubr.msk.bf16.vlgmr.msra.gmra.mxu0 %vm122_vm3, %v602_v10 }
  0xec   :  { %343 = vmatprep.mubr.bf16.mxu0 %v627_v1 }
  0xf3   :  { %569 = vmatmul.mubr.msk.bf16.gmra.mxu0 %vm122_vm3, %v604_v12 }
 0x1a3   :  { %v231_v40 = vpop.f32.mrf.mxu0 }
 0x1a5   :  { %v233_v41 = vpop.f32.mrf.mxu0 }
 0x1a6   :  { %v238_v42 = vmax.f32 %v231_v40, %v233_v41 }
 0x1a7   :  { %v235_v43 = vpop.f32.mrf.mxu0 }
 0x1a8   :  { %239 = vmax.xlane.f32.xlu0 %v238_v42 }
 0x1a9   :  { %v236_v44 = vpop.f32.mrf.mxu0 }
 0x1ab   :  { %v335_v45 = vpop.f32.mrf.mxu0 }
 0x1ad   :  { %v337_v46 = vpop.f32.mrf.mxu0 }
 0x1af   :  { %v339_v47 = vpop.f32.mrf.mxu0 }
 0x1b0   :  { %v354_v56 = vpack.c.bf16 %v339_v47, %v335_v45  ;;  %v572_v45 = vld [vmem:[%s758_s7] ss:$0 sm:$0xff] }
 0x1b1   :  { %v341_v48 = vpop.f32.mrf.mxu0 }
 0x1b2   :  { %v355_v54 = vpack.c.bf16 %v341_v48, %v337_v46 }
 0x1b3   :  { %v345_v49 = vpop.f32.mrf.mxu0 }
 0x1b5   :  { %v347_v50 = vpop.f32.mrf.mxu0 }
 0x1b7   :  { %v349_v51 = vpop.f32.mrf.mxu0 }
 0x1b8   :  { %v356_v52 = vpack.c.bf16 %v349_v51, %v345_v49 }
 0x1b9   :  { %v351_v53 = vpop.f32.mrf.mxu0 }
 0x1ba   :  { %v357_v55 = vpack.c.bf16 %v351_v53, %v347_v50 }
 0x1bc   :  { %433 = vmatprep.subr.bf16.mxu0 %v357_v55  ;;  %375 = vmatprep.subr.bf16.mxu1 %v357_v55 }
 0x1bd   :  { %434 = vmatpush1.bf16.xpose.msra.mxu0 %v356_v52 }
 0x1be   :  { %435 = vmatprep.subr.bf16.mxu0 %v355_v54 }
 0x1c5   :  { %436 = vmatpush1.bf16.xpose.msra.mxu0 %v354_v56 }
 0x231   :  { %v240_v57 = vpop.xlane.xlu0 %239 }
 0x232   :  { %v241_v58 = vsub.f32 %v231_v40, %v240_v57  ;;  %v242_v59 = vsub.f32 %v233_v41, %v240_v57 }
 0x234   :  { %v243_v60 = vmul.f32 1.442695, %v241_v58  ;;  %v245_v61 = vmul.f32 1.442695, %v242_v59 }
 0x236   :  { %607 = vpow2.f32 %v243_v60 }
 0x237   :  { %609 = vpow2.f32 %v245_v61 }
 0x243   :  { %v608_v62 = vpop.eup %607 }
 0x244   :  { %v610_v63 = vpop.eup %609 }
 0x245   :  { %v247_v0 = vadd.f32 %v610_v63, %v608_v62 }
 0x247   :  { %248 = vadd.xlane.f32.xlu0 %v247_v0 }
 0x2d0   :  { %v249_v3 = vpop.xlane.xlu0 %248 }
 0x2d1   :  { %611 = vrcp.f32 %v249_v3 }
 0x2de   :  { %v612_v4 = vpop.eup %611 }
 0x2df   :  { %v252_v5 = vmul.f32 %v612_v4, %v610_v63  ;;  %v251_v6 = vmul.f32 %v612_v4, %v608_v62 }
 0x2e1   :  { %v254_v7 = vpack.c.bf16 %v252_v5, %v252_v5  ;;  %v253_v8 = vpack.c.bf16 %v251_v6, %v251_v6 }
 0x2e3   :  { %287 = vmatprep.mubr.bf16.mxu1 %v254_v7 }
 0x2e4   :  { %288 = vmatmul.mubr.bf16.vlgmr.msra.gmra.mxu1 %v253_v8 }
 0x2e5   :  { %376 = vmatpush1.bf16.msra.mxu1 %v356_v52  ;;  %395 = vmatprep.mubr.bf16.mxu1 %v627_v1 }
 0x2e6   :  { %377 = vmatprep.subr.bf16.mxu1 %v355_v54 }
 0x2e9   :  { %378 = vmatpush1.bf16.msra.mxu1 %v354_v56 }
 0x2ea   :  { %589 = vmatprep.subr.bf16.mxu1 %v628_v2 }
 0x2ec   :  { %570 = vmatmul.mubr.msk.bf16.vlgmr.msra.gmra.mxu1 %vm193_vm4, %v359_v9 }
 0x2ed   :  { %593 = vmatprep.mubr.msk.bf16.mxu1 %vm629_vm1, %v628_v2  ;;  %590 = vmatpush3.bf16.msra.mxu1 %v605_v34 }
 0x2ee   :  { %591 = vmatprep.subr.bf16.mxu1 %v628_v2 }
 0x2f1   :  { %592 = vmatpush3.bf16.msra.mxu1 %v606_v35 }
 0x3a4   :  { %v289_v10 = vpop.f32.mrf.mxu1 }
 0x3a5   :  { %v461_v36 = vadd.f32 %v289_v10, %v709_v28 }
 0x3a6   :  { %v291_v11 = vpop.f32.mrf.mxu1 }
 0x3a7   :  { %v470_v41 = vadd.f32 %v571_v37, %v461_v36 }
 0x3a8   :  { %v292_v12 = vpop.f32.mrf.mxu1 }
 0x3aa   :  { %v293_v13 = vpop.f32.mrf.mxu1 }
 0x3ac   :  { %v397_v14 = vpop.f32.mrf.mxu1 }
 0x3ae   :  { %v399_v15 = vpop.f32.mrf.mxu1 }
 0x3af   :  { %v404_v16 = vmax.f32 %v397_v14, %v399_v15 }
 0x3b0   :  { %v401_v17 = vpop.f32.mrf.mxu1 }
 0x3b1   :  { %405 = vmax.xlane.f32.xlu1 %v404_v16 }
 0x3b2   :  { %v402_v1 = vpop.f32.mrf.mxu1 }
 0x43a   :  { %v406_v18 = vpop.xlane.xlu1 %405 }
 0x43b   :  { %v407_v19 = vsub.f32 %v397_v14, %v406_v18  ;;  %v408_v20 = vsub.f32 %v399_v15, %v406_v18 }
 0x43d   :  { %v409_v21 = vmul.f32 1.442695, %v407_v19  ;;  %v411_v22 = vmul.f32 1.442695, %v408_v20 }
 0x43f   :  { %613 = vpow2.f32 %v409_v21 }
 0x440   :  { %615 = vpow2.f32 %v411_v22 }
 0x44c   :  { %v614_v23 = vpop.eup %613 }
 0x44d   :  { %v616_v24 = vpop.eup %615 }
 0x44e   :  { %v413_v25 = vadd.f32 %v616_v24, %v614_v23 }
 0x450   :  { %414 = vadd.xlane.f32.xlu1 %v413_v25 }
 0x4d9   :  { %v415_v26 = vpop.xlane.xlu1 %414 }
 0x4da   :  { %617 = vrcp.f32 %v415_v26 }
 0x4e7   :  { %v618_v27 = vpop.eup %617 }
 0x4e8   :  { %v418_v30 = vmul.f32 %v618_v27, %v616_v24  ;;  %v417_v31 = vmul.f32 %v618_v27, %v614_v23 }
 0x4ea   :  { %v420_v32 = vpack.c.bf16 %v418_v30, %v418_v30  ;;  %v419_v33 = vpack.c.bf16 %v417_v31, %v417_v31 }
 0x4ec   :  { %453 = vmatprep.mubr.bf16.mxu0 %v420_v32 }
 0x4ed   :  { %454 = vmatmul.mubr.bf16.vlgmr.msra.gmra.mxu0 %v419_v33 }
 0x5ad   :  { %v455_v38 = vpop.f32.mrf.mxu0 }
 0x5ae   :  { %v462_v39 = vadd.f32 %v455_v38, %v711_v29 }
 0x5af   :  { %v457_v40 = vpop.f32.mrf.mxu0 }
 0x5b0   :  { %v471_v42 = vadd.f32 %v571_v37, %v462_v39 }
 0x5b1   :  { %v458_v43 = vpop.f32.mrf.mxu0 }
 0x5b2   :  { %v472_v44 = vpack.c.bf16 %v471_v42, %v470_v41 }
 0x5b3   :  { %v459_v2 = vpop.f32.mrf.mxu0 }
 0x5b4   :  { %594 = vmatmul.mubr.msk.bf16.vlgmr.msra.gmra.mxu1 %vm193_vm4, %v472_v44 }
 0x674   :  { %v533_v28 = vpop.f32.mrf.mxu1 }
 0x675   :  { %v534_v46 = vadd.f32 %v572_v45, %v533_v28 }
 0x676   :  { %v595_v47 = vpop.f32.mrf.mxu1 }
 0x677   :  { %v576_v48 = vmul.f32 -1.442695, %v534_v46 }
 0x678   :  { %v536_v49 = vpop.f32.mrf.mxu1 }
 0x679   :  { %619 = vpow2.f32 %v576_v48  ;;  %v537_v50 = vadd.f32 %v572_v45, %v536_v49 }
 0x67a   :  { %v596_v29 = vpop.f32.mrf.mxu1 }
 0x67b   :  { %v577_v51 = vmul.f32 -1.442695, %v537_v50 }
 0x67d   :  { %621 = vpow2.f32 %v577_v51 }
 0x686   :  { %v620_v52 = vpop.eup %619 }
 0x687   :  { %v546_v53 = vadd.f32 1.0, %v620_v52 }
 0x689   :  { %623 = vrcp.f32 %v546_v53 }
 0x68a   :  { %v622_v54 = vpop.eup %621 }
 0x68b   :  { %v547_v55 = vadd.f32 1.0, %v622_v54 }
 0x68d   :  { %625 = vrcp.f32 %v547_v55 }
 0x696   :  { %v624_v56 = vpop.eup %623 }
 0x697   :  { %552 = vst.msk [vmem:[%s759_s8] sm:$0xff] %vm122_vm3, %v624_v56 }
 0x69a   :  { %v626_v57 = vpop.eup %625 }
 0x69b   :  { %553 = vst.msk [vmem:[%s759_s8 + $0x8] sm:$0xff] %vm122_vm3, %v626_v57 }

</bundles_post_ra>
